<compile_context>
chip_gen: v5e
topology: v5e:2x2
jax: 0.10.0
libtpu: 0.0.40
codegen_flags: <defaults>
</compile_context>

<pallas_src>
import functools

import jax
import jax.numpy as jnp
from jax.experimental import pallas as pl
from jax.experimental.pallas import tpu as pltpu


def _round_up(v, m):
    return (v + m - 1) // m * m


# ----------------------------------------------------------------------------
# Kernel
# ----------------------------------------------------------------------------
def _mlp_res_kernel(x_ref, w_ref, *rest, P, has_bias):
    """Fused residual MLP forward.

    x_ref : [TB, P]      activations (compute dtype, lane-padded)
    w_ref : [P, 4P]      packed weights (compute dtype):
                           cols [0   :  P] = w1  (padded)
                           cols [P   : 2P] = wr  (padded)   <- fused with w1
                           cols [2P  : 3P] = w2  (padded)
                           cols [3P  : 4P] = w3  (padded)
    b_ref : [1, 4P]      packed biases (f32), only when has_bias
    o_ref : [TB, P]      f32 output (lane-padded)
    """
    if has_bias:
        b_ref, o_ref = rest
        b = b_ref[...]
    else:
        (o_ref,) = rest

    x = x_ref[...]
    cd = x.dtype                     # matmul operand dtype (f32 or bf16)
    w = w_ref[...]

    # Stage 1 (fused): y = x @ [w1 | wr]  -> h1 (nonlin path) and res (residual).
    y = jnp.dot(x, w[:, 0:2 * P], preferred_element_type=jnp.float32)
    if has_bias:
        y = y + b[:, 0:2 * P]        # [b1 | br], broadcast over rows
    h1 = jnp.maximum(y[:, 0:P], 0.0)          # ReLU (f32, VPU)
    res = y[:, P:2 * P]                       # residual branch, already biased

    # Stage 2: hidden -> hidden.
    h2 = jnp.dot(h1.astype(cd), w[:, 2 * P:3 * P],
                 preferred_element_type=jnp.float32)
    if has_bias:
        h2 = h2 + b[:, 2 * P:3 * P]
    h2 = jnp.maximum(h2, 0.0)

    # Stage 3: hidden -> output, plus residual.
    out = jnp.dot(h2.astype(cd), w[:, 3 * P:4 * P],
                  preferred_element_type=jnp.float32)
    if has_bias:
        out = out + b[:, 3 * P:4 * P]
    o_ref[...] = (out + res).astype(o_ref.dtype)


# ----------------------------------------------------------------------------
# Parameter packing (done once, outside the per-call path)
# ----------------------------------------------------------------------------
def pack_params(params, zero_bias=True):
    """Pad every weight to a common [P, P] tile and pack into one [P, 4P] array."""
    w1, b1 = params["w1"], params["b1"]
    w2, b2 = params["w2"], params["b2"]
    w3, b3 = params["w3"], params["b3"]
    wr, br = params["wr"], params["br"]

    D_in, H = w1.shape
    O = w3.shape[1]
    P = _round_up(max(D_in, H, O), 128)

    W = jnp.zeros((P, 4 * P), jnp.float32)
    W = W.at[:D_in, 0:H].set(w1)                       # w1
    W = W.at[:D_in, P:P + O].set(wr)                   # wr (fused with w1)
    W = W.at[:H, 2 * P:2 * P + H].set(w2)              # w2
    W = W.at[:H, 3 * P:3 * P + O].set(w3)              # w3

    if zero_bias:
        b = None
    else:
        b = jnp.zeros((1, 4 * P), jnp.float32)
        b = b.at[:, 0:H].set(jnp.reshape(b1, (1, H)))
        b = b.at[:, P:P + O].set(jnp.reshape(br, (1, O)))
        b = b.at[:, 2 * P:2 * P + H].set(jnp.reshape(b2, (1, H)))
        b = b.at[:, 3 * P:3 * P + O].set(jnp.reshape(b3, (1, O)))

    return dict(W=W, b=b, dims=(int(D_in), int(H), int(O), int(P)))


# ----------------------------------------------------------------------------
# Forward
# ----------------------------------------------------------------------------
def mlp_res_net_with_time(packed, *ars, use_bf16=False):
    """Forward pass. `ars` are the module's positional inputs (e.g. x, u, dt)."""
    B = ars[0].shape[0]
    net_in = jnp.concatenate(
        [a.reshape(B, -1).astype(jnp.float32) for a in ars], axis=1)

    D_in, H, O, P = packed["dims"]
    assert net_in.shape[1] == D_in, (net_in.shape, D_in)
    W, b = packed["W"], packed["b"]
    has_bias = b is not None

    compute_dtype = jnp.bfloat16 if use_bf16 else jnp.float32

    # Batch tiling: <=512-row tiles, padded to a multiple of the tile.
    TB = min(512, _round_up(B, 8))
    Bp = _round_up(B, TB)

    # Lane-pad input to P columns (zeros contribute nothing: padded W rows are 0).
    x = jnp.zeros((Bp, P), compute_dtype).at[:B, :D_in].set(
        net_in.astype(compute_dtype))
    Wc = W.astype(compute_dtype)      # narrow the weight DMA too when bf16

    kernel = functools.partial(_mlp_res_kernel, P=P, has_bias=has_bias)

    in_specs = [
        pl.BlockSpec((TB, P), lambda i: (i, 0)),        # activations: tiled
        pl.BlockSpec((P, 4 * P), lambda i: (0, 0)),     # weights: resident
    ]
    inputs = [x, Wc]
    if has_bias:
        in_specs.append(pl.BlockSpec((1, 4 * P), lambda i: (0, 0)))
        inputs.append(b)

    out = pl.pallas_call(
        kernel,
        out_shape=jax.ShapeDtypeStruct((Bp, P), jnp.float32),
        grid=(Bp // TB,),
        in_specs=in_specs,
        out_specs=pl.BlockSpec((TB, P), lambda i: (i, 0)),
        compiler_params=pltpu.CompilerParams(
            dimension_semantics=("parallel",)),
    )(*inputs)

    return out[:B, :O]


# ----------------------------------------------------------------------------
# Init (mimics nn.Linear: U(-1/sqrt(fan_in), 1/sqrt(fan_in)); weights stored
# as [fan_in, fan_out], biases as [1, fan_out])
# ----------------------------------------------------------------------------
def init_params(key, input_size, output_size, n_hidden_nodes=64, zero_bias=True):
    def linear(key, fan_in, fan_out):
        kw, kb = jax.random.split(key)
        bound = 1.0 / jnp.sqrt(fan_in)
        w = jax.random.uniform(kw, (fan_in, fan_out), jnp.float32, -bound, bound)
        if zero_bias:
            b = jnp.zeros((1, fan_out), jnp.float32)
        else:
            b = jax.random.uniform(kb, (1, fan_out), jnp.float32, -bound, bound)
        return w, b

    k1, k2, k3, kr = jax.random.split(key, 4)
    w1, b1 = linear(k1, input_size, n_hidden_nodes)
    w2, b2 = linear(k2, n_hidden_nodes, n_hidden_nodes)
    w3, b3 = linear(k3, n_hidden_nodes, output_size)
    wr, br = linear(kr, input_size, output_size)
    return dict(w1=w1, b1=b1, w2=w2, b2=b2, w3=w3, b3=b3, wr=wr, br=br)


def _reference(params, *ars):
    B = ars[0].shape[0]
    net_in = jnp.concatenate([a.reshape(B, -1) for a in ars], axis=1)
    h = jnp.maximum(net_in @ params["w1"] + params["b1"], 0.0)
    h = jnp.maximum(h @ params["w2"] + params["b2"], 0.0)
    return h @ params["w3"] + params["b3"] + net_in @ params["wr"] + params["br"]


if __name__ == "__main__":
    # Shapes consistent with the module's forward(*ars):
    #   x  : [B, 4, 4]  (state -> 16),  u : [B, 3],  dt : [B, 1]
    # => concatenated feature size = 16 + 3 + 1 = 20
    B, out_dim, hidden = 2, 5, 64
    key = jax.random.PRNGKey(0)
    kx, ku, kt, kp = jax.random.split(key, 4)

    x = jax.random.normal(kx, (B, 4, 4), jnp.float32)
    u = jax.random.normal(ku, (B, 3), jnp.float32)
    dt = jax.random.uniform(kt, (B, 1), jnp.float32)

    in_features = 4 * 4 + 3 + 1

    # --- zero_bias=True (module default), f32 MXU operands: exact check ------
    params = init_params(kp, in_features, out_dim, n_hidden_nodes=hidden,
                         zero_bias=True)
    packed = pack_params(params, zero_bias=True)
    out = jax.block_until_ready(mlp_res_net_with_time(packed, x, u, dt))
    ref = _reference(params, x, u, dt)
    assert out.shape == (B, out_dim)
    assert jnp.allclose(out, ref, atol=1e-5, rtol=1e-5)

    # --- bf16 MXU operands (v6e/v7x recommendation), loose tolerance ---------
    out_bf16 = jax.block_until_ready(
        mlp_res_net_with_time(packed, x, u, dt, use_bf16=True))
    assert jnp.allclose(out_bf16, ref, atol=1e-1, rtol=1e-1)

    # --- non-zero-bias path (exercises has_bias=True kernel variant) ---------
    params_b = init_params(jax.random.PRNGKey(1), in_features, out_dim,
                           n_hidden_nodes=hidden, zero_bias=False)
    packed_b = pack_params(params_b, zero_bias=False)
    out_b = jax.block_until_ready(mlp_res_net_with_time(packed_b, x, u, dt))
    ref_b = _reference(params_b, x, u, dt)
    assert jnp.allclose(out_b, ref_b, atol=1e-5, rtol=1e-5)

    print("KERNEL_OK")
</pallas_src>

<mosaic_0001>
module attributes {stable_mosaic.version = 11 : i64} {
  func.func @_mlp_res_kernel(%arg0: i32, %arg1: memref<8x128xf32, #tpu.memory_space<vmem>>, %arg2: memref<128x512xf32, #tpu.memory_space<vmem>>, %arg3: memref<8x128xf32, #tpu.memory_space<vmem>>) attributes {dimension_semantics = [#tpu.dimension_semantics<parallel>], iteration_bounds = array<i64: 1>, scalar_prefetch = 0 : i64, scratch_operands = 0 : i64, tpu.core_type = #tpu.core_type<tc>, window_params = [{transform_indices = @transform_0, window_bounds = array<i64: 8, 128>}, {pipeline_mode = #tpu.pipeline_mode<synchronous>, transform_indices = @transform_1, window_bounds = array<i64: 128, 512>}, {transform_indices = @transform_2, window_bounds = array<i64: 8, 128>}]} {
    %c0 = arith.constant 0 : index
    %c0_0 = arith.constant 0 : index
    %0 = vector.load %arg1[%c0, %c0_0] : memref<8x128xf32, #tpu.memory_space<vmem>>, vector<8x128xf32>
    %c0_1 = arith.constant 0 : index
    %c0_2 = arith.constant 0 : index
    %1 = vector.load %arg2[%c0_1, %c0_2] : memref<128x512xf32, #tpu.memory_space<vmem>>, vector<128x512xf32>
    %2 = vector.extract_strided_slice %1 {offsets = [0, 0], sizes = [128, 256], strides = [1, 1]} : vector<128x512xf32> to vector<128x256xf32>
    %cst = arith.constant dense<0.000000e+00> : vector<8x256xf32>
    %3 = tpu.matmul %0, %2, %cst {dimension_numbers = #tpu.dot_dimension_numbers<[1], [0], [0], [1], [0, 0, 1, 1], [], []>} : vector<8x128xf32>, vector<128x256xf32>, vector<8x256xf32> -> vector<8x256xf32>
    %4 = vector.extract_strided_slice %3 {offsets = [0, 0], sizes = [8, 128], strides = [1, 1]} : vector<8x256xf32> to vector<8x128xf32>
    %cst_3 = arith.constant 0.000000e+00 : f32
    %5 = vector.broadcast %cst_3 : f32 to vector<8x128xf32>
    %6 = arith.maximumf %4, %5 : vector<8x128xf32>
    %7 = vector.extract_strided_slice %3 {offsets = [0, 128], sizes = [8, 128], strides = [1, 1]} : vector<8x256xf32> to vector<8x128xf32>
    %8 = vector.extract_strided_slice %1 {offsets = [0, 256], sizes = [128, 128], strides = [1, 1]} : vector<128x512xf32> to vector<128x128xf32>
    %cst_4 = arith.constant dense<0.000000e+00> : vector<8x128xf32>
    %9 = tpu.matmul %6, %8, %cst_4 {dimension_numbers = #tpu.dot_dimension_numbers<[1], [0], [0], [1], [0, 0, 1, 1], [], []>} : vector<8x128xf32>, vector<128x128xf32>, vector<8x128xf32> -> vector<8x128xf32>
    %cst_5 = arith.constant 0.000000e+00 : f32
    %10 = vector.broadcast %cst_5 : f32 to vector<8x128xf32>
    %11 = arith.maximumf %9, %10 : vector<8x128xf32>
    %12 = vector.extract_strided_slice %1 {offsets = [0, 384], sizes = [128, 128], strides = [1, 1]} : vector<128x512xf32> to vector<128x128xf32>
    %cst_6 = arith.constant dense<0.000000e+00> : vector<8x128xf32>
    %13 = tpu.matmul %11, %12, %cst_6 {dimension_numbers = #tpu.dot_dimension_numbers<[1], [0], [0], [1], [0, 0, 1, 1], [], []>} : vector<8x128xf32>, vector<128x128xf32>, vector<8x128xf32> -> vector<8x128xf32>
    %14 = arith.addf %13, %7 : vector<8x128xf32>
    %c0_7 = arith.constant 0 : index
    %c0_8 = arith.constant 0 : index
    %15 = vector.load %arg3[%c0_7, %c0_8] : memref<8x128xf32, #tpu.memory_space<vmem>>, vector<8x128xf32>
    tpu.vector_store %arg3[%c0_7, %c0_8], %14 {strides = array<i32>} : memref<8x128xf32, #tpu.memory_space<vmem>>, vector<8x128xf32>,
    return
  }
  func.func @transform_0(%arg0: i32) -> (i32, i32) {
    %c0_i32 = arith.constant 0 : i32
    %c0_i32_0 = arith.constant 0 : i32
    return %arg0, %c0_i32 : i32, i32
  }
  func.func @transform_1(%arg0: i32) -> (i32, i32) {
    %c0_i32 = arith.constant 0 : i32
    %c0_i32_0 = arith.constant 0 : i32
    %c0_i32_1 = arith.constant 0 : i32
    return %c0_i32, %c0_i32_0 : i32, i32
  }
  func.func @transform_2(%arg0: i32) -> (i32, i32) {
    %c0_i32 = arith.constant 0 : i32
    %c0_i32_0 = arith.constant 0 : i32
    return %arg0, %c0_i32 : i32, i32
  }
}

</mosaic_0001>

<bundles_post_ra>
// kernel: tpu_custom_call.1
= control target key start
LH: loop header
LB: loop body
LE: loop exit
PB: predicated region body
PF: predicated region fallthrough
CT: control target
= control target key end

     0   :  { %7 = vsyncpa [#allocation3], 0  ;;  %s324_s0 = inlined_call_operand.hbm [shape: f32[8,128], index: 0, kind: input, shape index: {}]   ;;  %s325_s1 = inlined_call_operand.hbm [shape: f32[128,512], index: 1, kind: input, shape index: {}]   ;;  %s326_s2 = inlined_call_operand.hbm [shape: f32[8,128], index: 2, kind: output, shape index: {}]  }
   0x1   :  { %8 = vsyncpa [#allocation6], 0 }
   0x2   :  { %9 = vsyncpa [#allocation4], 0  ;;  %s15_s11 = sshll.u32 %s324_s0, 4  ;;  %s291_s12 = smov [#allocation2]   ;;  %s16_s11 = int_to_ptr.hbm [resolvable:$true] %s15_s11 }
   0x3   :  { %s17_s13 = sshll.u32 %s291_s12, 4  ;;  %s25_s16 = sshll.u32 %s325_s1, 4  ;;  %s18_s13 = int_to_ptr.vmem [resolvable:$true] %s17_s13  ;;  %s26_s16 = int_to_ptr.hbm [resolvable:$true] %s25_s16 }
   0x4   :  { %20 = dma.hbm_to_vmem [thread:$0]  %s16_s11, 128, %s18_s13, [#allocation3]  }
   0x5   :  { %s292_s17 = smov [#allocation5]   ;;  %s293_s19 = smov 512  }
   0x6   :  { %s27_s18 = sshll.u32 %s292_s17, 4  ;;  %s294_s20 = smov 32   ;;  %s28_s18 = int_to_ptr.vmem [resolvable:$true] %s27_s18 }
   0x7   :  { %33 = dma.hbm_to_vmem [thread:$0]  %s26_s16, 8192, %s28_s18, [#allocation6], %s293_s19, %s293_s19, %s294_s20  }
   0x8   :  { %285 = dma.done.wait [#allocation3], 128  }
   0x9   :  { %286 = vsyncadd [#allocation3], 4294967168 }
   0xa   :  { %287 = dma.done.wait [#allocation6], 8192  }
   0xb   :  { %288 = vsyncadd [#allocation6], 4294959104  ;;  %v103_v0 = vld [vmem:[#allocation5 + $0x1e0] sm:$0xff]  ;;  %v105_v4 = vld [vmem:[#allocation5 + $0x1f0] sm:$0xff]  ;;  %s295_s0 = smov [#allocation7]   ;;  %s197_s23 = sshll.u32 %s326_s2, 4  ;;  %s198_s23 = int_to_ptr.hbm [resolvable:$true] %s197_s23 }
   0xc   :  { %v99_v1 = vld [vmem:[#allocation5 + $0x1c0] sm:$0xff]  ;;  %107 = vmatpush.msra.mxu0 %v103_v0  ;;  %148 = vmatpush.msra.mxu2 %v105_v4  ;;  %v101_v6 = vld [vmem:[#allocation5 + $0x1d0] sm:$0xff]  ;;  %v317_v29 = vld [vmem:[#allocation2] sm:$0xff]  ;;  %s195_s1 = sshll.u32 %s295_s0, 4  ;;  %s196_s1 = int_to_ptr.vmem [resolvable:$true] %s195_s1 }
   0xd   :  { %v95_v2 = vld [vmem:[#allocation5 + $0x1a0] sm:$0xff]  ;;  %v97_v7 = vld [vmem:[#allocation5 + $0x1b0] sm:$0xff]  ;;  %v106_v33 = vld [vmem:[#allocation5 + $0x1f8] sm:$0xff] }
   0xe   :  { %108 = vmatpush.msra.mxu0 %v99_v1  ;;  %v91_v3 = vld [vmem:[#allocation5 + $0x180] sm:$0xff]  ;;  %149 = vmatpush.msra.mxu2 %v101_v6  ;;  %v93_v9 = vld [vmem:[#allocation5 + $0x190] sm:$0xff]  ;;  %v102_v34 = vld [vmem:[#allocation5 + $0x1d8] sm:$0xff] }
   0xf   :  { %v87_v5 = vld [vmem:[#allocation5 + $0x160] sm:$0xff]  ;;  %v89_v11 = vld [vmem:[#allocation5 + $0x170] sm:$0xff]  ;;  %169 = vmatpush.msra.mxu3 %v106_v33  ;;  %v104_v35 = vld [vmem:[#allocation5 + $0x1e8] sm:$0xff] }
  0x10   :  { %109 = vmatpush.msra.mxu0 %v95_v2  ;;  %v83_v8 = vld [vmem:[#allocation5 + $0x140] sm:$0xff]  ;;  %150 = vmatpush.msra.mxu2 %v97_v7  ;;  %v85_v13 = vld [vmem:[#allocation5 + $0x150] sm:$0xff]  ;;  %v100_v36 = vld [vmem:[#allocation5 + $0x1c8] sm:$0xff] }
  0x11   :  { %v79_v10 = vld [vmem:[#allocation5 + $0x120] sm:$0xff]  ;;  %v81_v15 = vld [vmem:[#allocation5 + $0x130] sm:$0xff]  ;;  %v98_v37 = vld [vmem:[#allocation5 + $0x1b8] sm:$0xff]  ;;  %127 = vmatpush.msra.mxu1 %v104_v35  ;;  %170 = vmatpush.msra.mxu3 %v102_v34 }
  0x12   :  { %110 = vmatpush.msra.mxu0 %v91_v3  ;;  %v75_v12 = vld [vmem:[#allocation5 + $0x100] sm:$0xff]  ;;  %151 = vmatpush.msra.mxu2 %v93_v9  ;;  %v77_v17 = vld [vmem:[#allocation5 + $0x110] sm:$0xff]  ;;  %v96_v38 = vld [vmem:[#allocation5 + $0x1a8] sm:$0xff] }
  0x13   :  { %v71_v14 = vld [vmem:[#allocation5 + $0xe0] sm:$0xff]  ;;  %v73_v19 = vld [vmem:[#allocation5 + $0xf0] sm:$0xff]  ;;  %v94_v39 = vld [vmem:[#allocation5 + $0x198] sm:$0xff]  ;;  %128 = vmatpush.msra.mxu1 %v100_v36  ;;  %171 = vmatpush.msra.mxu3 %v98_v37 }
  0x14   :  { %111 = vmatpush.msra.mxu0 %v87_v5  ;;  %152 = vmatpush.msra.mxu2 %v89_v11  ;;  %v67_v16 = vld [vmem:[#allocation5 + $0xc0] sm:$0xff]  ;;  %v69_v21 = vld [vmem:[#allocation5 + $0xd0] sm:$0xff]  ;;  %v92_v40 = vld [vmem:[#allocation5 + $0x188] sm:$0xff] }
  0x15   :  { %v63_v18 = vld [vmem:[#allocation5 + $0xa0] sm:$0xff]  ;;  %v65_v23 = vld [vmem:[#allocation5 + $0xb0] sm:$0xff]  ;;  %v90_v41 = vld [vmem:[#allocation5 + $0x178] sm:$0xff]  ;;  %129 = vmatpush.msra.mxu1 %v96_v38  ;;  %172 = vmatpush.msra.mxu3 %v94_v39 }
  0x16   :  { %112 = vmatpush.msra.mxu0 %v83_v8  ;;  %153 = vmatpush.msra.mxu2 %v85_v13  ;;  %v59_v20 = vld [vmem:[#allocation5 + $0x80] sm:$0xff]  ;;  %v61_v25 = vld [vmem:[#allocation5 + $0x90] sm:$0xff]  ;;  %v88_v42 = vld [vmem:[#allocation5 + $0x168] sm:$0xff] }
  0x17   :  { %v55_v22 = vld [vmem:[#allocation5 + $0x60] sm:$0xff]  ;;  %v57_v27 = vld [vmem:[#allocation5 + $0x70] sm:$0xff]  ;;  %v86_v43 = vld [vmem:[#allocation5 + $0x158] sm:$0xff]  ;;  %130 = vmatpush.msra.mxu1 %v92_v40  ;;  %173 = vmatpush.msra.mxu3 %v90_v41 }
  0x18   :  { %113 = vmatpush.msra.mxu0 %v79_v10  ;;  %154 = vmatpush.msra.mxu2 %v81_v15  ;;  %v51_v24 = vld [vmem:[#allocation5 + $0x40] sm:$0xff]  ;;  %v53_v30 = vld [vmem:[#allocation5 + $0x50] sm:$0xff]  ;;  %v84_v44 = vld [vmem:[#allocation5 + $0x148] sm:$0xff] }
  0x19   :  { %v47_v26 = vld [vmem:[#allocation5 + $0x20] sm:$0xff]  ;;  %v49_v31 = vld [vmem:[#allocation5 + $0x30] sm:$0xff]  ;;  %v82_v45 = vld [vmem:[#allocation5 + $0x138] sm:$0xff]  ;;  %131 = vmatpush.msra.mxu1 %v88_v42  ;;  %174 = vmatpush.msra.mxu3 %v86_v43 }
  0x1a   :  { %114 = vmatpush.msra.mxu0 %v75_v12  ;;  %155 = vmatpush.msra.mxu2 %v77_v17  ;;  %v43_v28 = vld [vmem:[#allocation5] sm:$0xff]  ;;  %v45_v32 = vld [vmem:[#allocation5 + $0x10] sm:$0xff]  ;;  %v80_v46 = vld [vmem:[#allocation5 + $0x128] sm:$0xff] }
  0x1b   :  { %v78_v47 = vld [vmem:[#allocation5 + $0x118] sm:$0xff]  ;;  %132 = vmatpush.msra.mxu1 %v84_v44  ;;  %175 = vmatpush.msra.mxu3 %v82_v45  ;;  %v76_v48 = vld [vmem:[#allocation5 + $0x108] sm:$0xff] }
  0x1c   :  { %115 = vmatpush.msra.mxu0 %v71_v14  ;;  %156 = vmatpush.msra.mxu2 %v73_v19  ;;  %v74_v49 = vld [vmem:[#allocation5 + $0xf8] sm:$0xff]  ;;  %v72_v50 = vld [vmem:[#allocation5 + $0xe8] sm:$0xff] }
  0x1d   :  { %133 = vmatpush.msra.mxu1 %v80_v46  ;;  %176 = vmatpush.msra.mxu3 %v78_v47  ;;  %v70_v51 = vld [vmem:[#allocation5 + $0xd8] sm:$0xff]  ;;  %v68_v52 = vld [vmem:[#allocation5 + $0xc8] sm:$0xff] }
  0x1e   :  { %116 = vmatpush.msra.mxu0 %v67_v16  ;;  %157 = vmatpush.msra.mxu2 %v69_v21  ;;  %v66_v53 = vld [vmem:[#allocation5 + $0xb8] sm:$0xff]  ;;  %v64_v54 = vld [vmem:[#allocation5 + $0xa8] sm:$0xff] }
  0x1f   :  { %134 = vmatpush.msra.mxu1 %v76_v48  ;;  %177 = vmatpush.msra.mxu3 %v74_v49  ;;  %v62_v55 = vld [vmem:[#allocation5 + $0x98] sm:$0xff]  ;;  %v60_v56 = vld [vmem:[#allocation5 + $0x88] sm:$0xff] }
  0x20   :  { %117 = vmatpush.msra.mxu0 %v63_v18  ;;  %158 = vmatpush.msra.mxu2 %v65_v23  ;;  %v58_v57 = vld [vmem:[#allocation5 + $0x78] sm:$0xff]  ;;  %v56_v62 = vld [vmem:[#allocation5 + $0x68] sm:$0xff] }
  0x21   :  { %135 = vmatpush.msra.mxu1 %v72_v50  ;;  %178 = vmatpush.msra.mxu3 %v70_v51  ;;  %v54_v58 = vld [vmem:[#allocation5 + $0x58] sm:$0xff]  ;;  %v52_v0 = vld [vmem:[#allocation5 + $0x48] sm:$0xff] }
  0x22   :  { %118 = vmatpush.msra.mxu0 %v59_v20  ;;  %159 = vmatpush.msra.mxu2 %v61_v25  ;;  %v50_v61 = vld [vmem:[#allocation5 + $0x38] sm:$0xff]  ;;  %v48_v1 = vld [vmem:[#allocation5 + $0x28] sm:$0xff] }
  0x23   :  { %136 = vmatpush.msra.mxu1 %v68_v52  ;;  %179 = vmatpush.msra.mxu3 %v66_v53  ;;  %v46_v63 = vld [vmem:[#allocation5 + $0x18] sm:$0xff]  ;;  %v44_v2 = vld [vmem:[#allocation5 + $0x8] sm:$0xff] }
  0x24   :  { %119 = vmatpush.msra.mxu0 %v55_v22  ;;  %160 = vmatpush.msra.mxu2 %v57_v27 }
  0x25   :  { %137 = vmatpush.msra.mxu1 %v64_v54  ;;  %180 = vmatpush.msra.mxu3 %v62_v55 }
  0x26   :  { %120 = vmatpush.msra.mxu0 %v51_v24  ;;  %161 = vmatpush.msra.mxu2 %v53_v30 }
  0x27   :  { %138 = vmatpush.msra.mxu1 %v60_v56  ;;  %181 = vmatpush.msra.mxu3 %v58_v57 }
  0x28   :  { %121 = vmatpush.msra.mxu0 %v47_v26  ;;  %162 = vmatpush.msra.mxu2 %v49_v31 }
  0x29   :  { %182 = vmatpush.msra.mxu3 %v54_v58  ;;  %139 = vmatpush.msra.mxu1 %v56_v62 }
  0x2a   :  { %122 = vmatpush.msra.mxu0 %v43_v28  ;;  %163 = vmatpush.msra.mxu2 %v45_v32 }
  0x2b   :  { %123 = vmatmul.f32.vlgmr.msra.gmra.mxu0 %v317_v29  ;;  %183 = vmatpush.msra.mxu3 %v50_v61 }
  0x2c   :  { %140 = vmatpush.msra.mxu1 %v52_v0 }
  0x2d   :  { %184 = vmatpush.msra.mxu3 %v46_v63 }
  0x2e   :  { %141 = vmatpush.msra.mxu1 %v48_v1 }
  0x30   :  { %142 = vmatpush.msra.mxu1 %v44_v2 }
  0x31   :  { %143 = vmatmul.f32.vlgmr.msra.gmra.mxu1 %v317_v29 }
  0xa8   :  { %v124_v59 = vpop.f32.mrf.mxu0 }
  0xa9   :  { %v147_v60 = vmax.f32 %v124_v59, 0.0 }
  0xab   :  { %164 = vmatmul.f32.vlgmr.msra.gmra.mxu2 %v147_v60 }
  0xae   :  { %v144_v5 = vpop.f32.mrf.mxu1 }
 0x12e   :  { %v165_v3 = vpop.f32.mrf.mxu2 }
 0x12f   :  { %v168_v4 = vmax.f32 %v165_v3, 0.0 }
 0x131   :  { %185 = vmatmul.f32.vlgmr.msra.gmra.mxu3 %v168_v4 }
 0x1b4   :  { %v186_v6 = vpop.f32.mrf.mxu3 }
 0x1b5   :  { %v187_v7 = vadd.f32 %v186_v6, %v144_v5 }
 0x1b7   :  { %189 = vst [vmem:[#allocation7] sm:$0xff] %v187_v7 }
 0x1b8   :  { %200 = dma.vmem_to_hbm [thread:$0]  %s196_s1, 128, %s198_s23, [#allocation4]  }
 0x1b9   :  { %289 = dma.done.wait [#allocation4], 128  }
 0x1ba   :  { %290 = vsyncadd [#allocation4], 4294967168 }
 0x1bb   :  { %205 = vsyncpa [#allocation3], 1 }
 0x1bc   :  { %206 = vsyncpa [#allocation6], 1 }
 0x1bd   :  { %207 = vsyncpa [#allocation4], 1 }

</bundles_post_ra>
